<compile_context>
chip_gen: v7x
topology: tpu7x:2x2x1
jax: 0.10.0
libtpu: 0.0.40
codegen_flags: <defaults>
</compile_context>

<pallas_src>
import jax
import jax.numpy as jnp
from jax.experimental import pallas as pl
from jax.experimental.pallas import tpu as pltpu


def _policy_s_kernel(x_ref,
                     w1_ref, b1_ref,
                     w2_ref, b2_ref,
                     w3_ref, b3_ref,
                     w4_ref, b4_ref,
                     o_ref):
    """(Linear -> ReLU) x3 -> Linear(out=1) -> sigmoid, feature-major layout.

    x_ref: (IN, TILE_B) bf16, batch on lanes. All activations are
    [features, TILE_B] so every matmul is canonical [M,K]@[K,N].
    """
    # Layer 1: (H, IN) @ (IN, TILE_B) -> (H, TILE_B), f32 accumulation on MXU.
    h = jnp.dot(w1_ref[...], x_ref[...], preferred_element_type=jnp.float32)
    h = jnp.maximum(h + b1_ref[...], 0.0)            # bias column (H,1) + ReLU, VPU

    # Layers 2-3: (H, H) @ (H, TILE_B), bf16 inputs / f32 accumulation.
    h = jnp.dot(w2_ref[...], h.astype(jnp.bfloat16),
                preferred_element_type=jnp.float32)
    h = jnp.maximum(h + b2_ref[...], 0.0)

    h = jnp.dot(w3_ref[...], h.astype(jnp.bfloat16),
                preferred_element_type=jnp.float32)
    h = jnp.maximum(h + b3_ref[...], 0.0)

    # Layer 4 (out_dim == 1): VPU multiply + sublane reduction instead of an
    # N=1 MXU matmul; result is a lane-dense (1, TILE_B) row -> unmasked vst.
    logits = jnp.sum(h * w4_ref[...], axis=0, keepdims=True) + b4_ref[...]
    o_ref[...] = jax.nn.sigmoid(logits).astype(o_ref.dtype)


def _round_up(a, m):
    return (a + m - 1) // m * m


def policy_s_forward(x, params, *, max_tile_b=4096):
    """x: [B, input_dim] f32 (or bf16). params: PyTorch-layout dict
    (w{i}: [out, in], b{i}: [out]). Returns [B, 1] f32 (eval-mode forward)."""
    B, in_dim = x.shape
    hidden = params["w1"].shape[0]
    out_dim = params["w4"].shape[0]
    assert out_dim == 1, "Policy_S stopping head expects output_dim == 1"
    # TODO(synk): output_dim > 1 would need an MXU path for the final layer.

    # Batch tile: lane-multiple (128). Split into >= 2 tiles whenever B allows
    # so ("parallel",) can shard across both v7x TensorCores; large tiles
    # amortize the ~0.35us per-grid-step pipeline overhead.
    tile_b = max(128, min(max_tile_b, _round_up(pl.cdiv(B, 2), 128)))
    b_pad = _round_up(B, tile_b)
    num_tiles = b_pad // tile_b

    # Single fused relayout: bf16 cast + transpose to feature-major (IN, B)
    # + pad of the batch (lane) axis. No separate full-array pad pass, and the
    # kernel's per-tile x DMA is bf16 (half the traffic of f32).
    x_fm = jnp.pad(x.astype(jnp.bfloat16).T, ((0, 0), (0, b_pad - B)))

    # bf16 weights for the MXU; biases and the tiny last layer stay f32.
    w1 = params["w1"].astype(jnp.bfloat16)                     # (H, IN)
    w2 = params["w2"].astype(jnp.bfloat16)                     # (H, H)
    w3 = params["w3"].astype(jnp.bfloat16)                     # (H, H)
    b1 = params["b1"].astype(jnp.float32)[:, None]             # (H, 1)
    b2 = params["b2"].astype(jnp.float32)[:, None]             # (H, 1)
    b3 = params["b3"].astype(jnp.float32)[:, None]             # (H, 1)
    w4 = params["w4"].astype(jnp.float32).reshape(hidden, 1)   # (H, 1) column
    b4 = params["b4"].astype(jnp.float32).reshape(1, 1)        # (1, 1)

    grid_spec = pltpu.PrefetchScalarGridSpec(
        num_scalar_prefetch=0,
        grid=(num_tiles,),
        in_specs=[
            pl.BlockSpec((in_dim, tile_b), lambda i: (0, i)),   # x: feature-major, batch-tiled
            # Constant index_maps -> weights/biases DMA'd once, stay VMEM-resident.
            # TODO(synk): if hidden is ever scaled up (>=1024), single-buffer these
            # (pipeline_mode=pl.Buffered(1)) to avoid doubling resident weight VMEM.
            pl.BlockSpec((hidden, in_dim), lambda i: (0, 0)),   # w1
            pl.BlockSpec((hidden, 1),      lambda i: (0, 0)),   # b1
            pl.BlockSpec((hidden, hidden), lambda i: (0, 0)),   # w2
            pl.BlockSpec((hidden, 1),      lambda i: (0, 0)),   # b2
            pl.BlockSpec((hidden, hidden), lambda i: (0, 0)),   # w3
            pl.BlockSpec((hidden, 1),      lambda i: (0, 0)),   # b3
            pl.BlockSpec((hidden, 1),      lambda i: (0, 0)),   # w4 column
            pl.BlockSpec((1, 1),           lambda i: (0, 0)),   # b4
        ],
        out_specs=pl.BlockSpec((1, tile_b), lambda i: (0, i)),  # lane-dense output row
    )

    out = pl.pallas_call(
        _policy_s_kernel,
        out_shape=jax.ShapeDtypeStruct((1, b_pad), jnp.float32),
        grid_spec=grid_spec,
        compiler_params=pltpu.CompilerParams(
            dimension_semantics=("parallel",),
            # Raise the scoped-VMEM ceiling so large batch tiles compile on every
            # generation (v5e default 16 MiB, v6e/v7x 32 MiB); 48 MiB stays under
            # v7x's 64 MiB physical VMEM per TensorCore.
            vmem_limit_bytes=48 * 1024 * 1024),
    )(x_fm, w1, b1, w2, b2, w3, b3, w4, b4)

    # Lane-dense (1, b_pad) row -> (B, 1): trivial reshape (same linear order).
    return out.reshape(b_pad, 1)[:B]


def init_params(key, input_dim, hidden_dim, output_dim):
    """nn.Linear-style init, PyTorch layout: w{i} [out, in], b{i} [out]."""
    dims = [(input_dim, hidden_dim),
            (hidden_dim, hidden_dim),
            (hidden_dim, hidden_dim),
            (hidden_dim, output_dim)]
    params = {}
    keys = jax.random.split(key, 2 * len(dims))
    for i, (fan_in, fan_out) in enumerate(dims):
        bound = 1.0 / jnp.sqrt(jnp.float32(fan_in))
        params[f"w{i+1}"] = jax.random.uniform(
            keys[2 * i], (fan_out, fan_in), jnp.float32, -bound, bound)
        params[f"b{i+1}"] = jax.random.uniform(
            keys[2 * i + 1], (fan_out,), jnp.float32, -bound, bound)
    return params


def _reference(x, p):
    """Pure-JAX reference mirroring the kernel's bf16-matmul / f32-accum numerics."""
    def layer(h, w, b):
        y = jnp.dot(h.astype(jnp.bfloat16), w.astype(jnp.bfloat16).T,
                    preferred_element_type=jnp.float32) + b[None, :]
        return jnp.maximum(y, 0.0)

    h = layer(x, p["w1"], p["b1"])
    h = layer(h, p["w2"], p["b2"])
    h = layer(h, p["w3"], p["b3"])
    # Final layer in f32, elementwise + reduce (matches the kernel's VPU path).
    logits = jnp.sum(h * p["w4"][0][None, :], axis=-1, keepdims=True) + p["b4"][None, :]
    return jax.nn.sigmoid(logits)


if __name__ == "__main__":
    key = jax.random.PRNGKey(0)
    k_param, k_x = jax.random.split(key)

    batch, input_dim, hidden_dim, output_dim = 8, 32, 128, 1

    params = init_params(k_param, input_dim, hidden_dim, output_dim)
    x = jax.random.normal(k_x, (batch, input_dim), jnp.float32)

    out = policy_s_forward(x, params)
    out = jax.block_until_ready(out)

    ref = _reference(x, params)
    assert out.shape == (batch, output_dim), out.shape
    assert jnp.allclose(out, ref, atol=2e-3, rtol=2e-3), (
        f"mismatch vs reference (max abs err {jnp.max(jnp.abs(out - ref)):.3e})")

    print("KERNEL_OK")
</pallas_src>

<mosaic_0001>
module attributes {stable_mosaic.version = 11 : i64} {
  func.func @_policy_s_kernel(%arg0: i32, %arg1: memref<32x128xbf16, #tpu.memory_space<vmem>>, %arg2: memref<128x32xbf16, #tpu.memory_space<vmem>>, %arg3: memref<128x1xf32, #tpu.memory_space<vmem>>, %arg4: memref<128x128xbf16, #tpu.memory_space<vmem>>, %arg5: memref<128x1xf32, #tpu.memory_space<vmem>>, %arg6: memref<128x128xbf16, #tpu.memory_space<vmem>>, %arg7: memref<128x1xf32, #tpu.memory_space<vmem>>, %arg8: memref<128x1xf32, #tpu.memory_space<vmem>>, %arg9: memref<1x1xf32, #tpu.memory_space<vmem>>, %arg10: memref<1x128xf32, #tpu.memory_space<vmem>>) attributes {dimension_semantics = [#tpu.dimension_semantics<parallel>], iteration_bounds = array<i64: 1>, scalar_prefetch = 0 : i64, scratch_operands = 0 : i64, tpu.core_type = #tpu.core_type<tc>, window_params = [{transform_indices = @transform_0, window_bounds = array<i64: 32, 128>}, {pipeline_mode = #tpu.pipeline_mode<synchronous>, transform_indices = @transform_1, window_bounds = array<i64: 128, 32>}, {pipeline_mode = #tpu.pipeline_mode<synchronous>, transform_indices = @transform_2, window_bounds = array<i64: 128, 1>}, {pipeline_mode = #tpu.pipeline_mode<synchronous>, transform_indices = @transform_3, window_bounds = array<i64: 128, 128>}, {pipeline_mode = #tpu.pipeline_mode<synchronous>, transform_indices = @transform_4, window_bounds = array<i64: 128, 1>}, {pipeline_mode = #tpu.pipeline_mode<synchronous>, transform_indices = @transform_5, window_bounds = array<i64: 128, 128>}, {pipeline_mode = #tpu.pipeline_mode<synchronous>, transform_indices = @transform_6, window_bounds = array<i64: 128, 1>}, {pipeline_mode = #tpu.pipeline_mode<synchronous>, transform_indices = @transform_7, window_bounds = array<i64: 128, 1>}, {pipeline_mode = #tpu.pipeline_mode<synchronous>, transform_indices = @transform_8, window_bounds = array<i64: 1, 1>}, {transform_indices = @transform_9, window_bounds = array<i64: 1, 128>}]} {
    %c0 = arith.constant 0 : index
    %c0_0 = arith.constant 0 : index
    %0 = vector.load %arg2[%c0, %c0_0] : memref<128x32xbf16, #tpu.memory_space<vmem>>, vector<128x32xbf16>
    %c0_1 = arith.constant 0 : index
    %c0_2 = arith.constant 0 : index
    %1 = vector.load %arg1[%c0_1, %c0_2] : memref<32x128xbf16, #tpu.memory_space<vmem>>, vector<32x128xbf16>
    %cst = arith.constant dense<0.000000e+00> : vector<128x128xf32>
    %2 = tpu.matmul %0, %1, %cst {dimension_numbers = #tpu.dot_dimension_numbers<[1], [0], [0], [1], [0, 0, 1, 1], [], []>} : vector<128x32xbf16>, vector<32x128xbf16>, vector<128x128xf32> -> vector<128x128xf32>
    %c0_3 = arith.constant 0 : index
    %c0_4 = arith.constant 0 : index
    %3 = vector.load %arg3[%c0_3, %c0_4] : memref<128x1xf32, #tpu.memory_space<vmem>>, vector<128x1xf32>
    %4 = vector.broadcast %3 : vector<128x1xf32> to vector<128x128xf32>
    %5 = arith.addf %2, %4 : vector<128x128xf32>
    %cst_5 = arith.constant 0.000000e+00 : f32
    %6 = vector.broadcast %cst_5 : f32 to vector<128x128xf32>
    %7 = arith.maximumf %5, %6 : vector<128x128xf32>
    %c0_6 = arith.constant 0 : index
    %c0_7 = arith.constant 0 : index
    %8 = vector.load %arg4[%c0_6, %c0_7] : memref<128x128xbf16, #tpu.memory_space<vmem>>, vector<128x128xbf16>
    %9 = arith.truncf %7 : vector<128x128xf32> to vector<128x128xbf16>
    %cst_8 = arith.constant dense<0.000000e+00> : vector<128x128xf32>
    %10 = tpu.matmul %8, %9, %cst_8 {dimension_numbers = #tpu.dot_dimension_numbers<[1], [0], [0], [1], [0, 0, 1, 1], [], []>} : vector<128x128xbf16>, vector<128x128xbf16>, vector<128x128xf32> -> vector<128x128xf32>
    %c0_9 = arith.constant 0 : index
    %c0_10 = arith.constant 0 : index
    %11 = vector.load %arg5[%c0_9, %c0_10] : memref<128x1xf32, #tpu.memory_space<vmem>>, vector<128x1xf32>
    %12 = vector.broadcast %11 : vector<128x1xf32> to vector<128x128xf32>
    %13 = arith.addf %10, %12 : vector<128x128xf32>
    %cst_11 = arith.constant 0.000000e+00 : f32
    %14 = vector.broadcast %cst_11 : f32 to vector<128x128xf32>
    %15 = arith.maximumf %13, %14 : vector<128x128xf32>
    %c0_12 = arith.constant 0 : index
    %c0_13 = arith.constant 0 : index
    %16 = vector.load %arg6[%c0_12, %c0_13] : memref<128x128xbf16, #tpu.memory_space<vmem>>, vector<128x128xbf16>
    %17 = arith.truncf %15 : vector<128x128xf32> to vector<128x128xbf16>
    %cst_14 = arith.constant dense<0.000000e+00> : vector<128x128xf32>
    %18 = tpu.matmul %16, %17, %cst_14 {dimension_numbers = #tpu.dot_dimension_numbers<[1], [0], [0], [1], [0, 0, 1, 1], [], []>} : vector<128x128xbf16>, vector<128x128xbf16>, vector<128x128xf32> -> vector<128x128xf32>
    %c0_15 = arith.constant 0 : index
    %c0_16 = arith.constant 0 : index
    %19 = vector.load %arg7[%c0_15, %c0_16] : memref<128x1xf32, #tpu.memory_space<vmem>>, vector<128x1xf32>
    %20 = vector.broadcast %19 : vector<128x1xf32> to vector<128x128xf32>
    %21 = arith.addf %18, %20 : vector<128x128xf32>
    %cst_17 = arith.constant 0.000000e+00 : f32
    %22 = vector.broadcast %cst_17 : f32 to vector<128x128xf32>
    %23 = arith.maximumf %21, %22 : vector<128x128xf32>
    %c0_18 = arith.constant 0 : index
    %c0_19 = arith.constant 0 : index
    %24 = vector.load %arg8[%c0_18, %c0_19] : memref<128x1xf32, #tpu.memory_space<vmem>>, vector<128x1xf32>
    %25 = vector.broadcast %24 : vector<128x1xf32> to vector<128x128xf32>
    %26 = arith.mulf %23, %25 : vector<128x128xf32>
    %cst_20 = arith.constant dense<0.000000e+00> : vector<128xf32>
    %27 = vector.multi_reduction <add>, %26, %cst_20 [0] : vector<128x128xf32> to vector<128xf32>
    %28 = vector.shape_cast %27 : vector<128xf32> to vector<1x128xf32>
    %c0_21 = arith.constant 0 : index
    %c0_22 = arith.constant 0 : index
    %29 = vector.load %arg9[%c0_21, %c0_22] : memref<1x1xf32, #tpu.memory_space<vmem>>, vector<1x1xf32>
    %30 = vector.broadcast %29 : vector<1x1xf32> to vector<1x128xf32>
    %31 = arith.addf %28, %30 : vector<1x128xf32>
    %32 = arith.negf %31 : vector<1x128xf32>
    %33 = math.exp %32 : vector<1x128xf32>
    %cst_23 = arith.constant 1.000000e+00 : f32
    %34 = vector.broadcast %cst_23 : f32 to vector<1x128xf32>
    %35 = arith.addf %34, %33 : vector<1x128xf32>
    %36 = arith.divf %34, %35 : vector<1x128xf32>
    %c0_24 = arith.constant 0 : index
    %c0_25 = arith.constant 0 : index
    %37 = vector.load %arg10[%c0_24, %c0_25] : memref<1x128xf32, #tpu.memory_space<vmem>>, vector<1x128xf32>
    tpu.vector_store %arg10[%c0_24, %c0_25], %36 {strides = array<i32>} : memref<1x128xf32, #tpu.memory_space<vmem>>, vector<1x128xf32>,
    return
  }
  func.func @transform_0(%arg0: i32) -> (i32, i32) {
    %c0_i32 = arith.constant 0 : i32
    %c0_i32_0 = arith.constant 0 : i32
    return %c0_i32, %arg0 : i32, i32
  }
  func.func @transform_1(%arg0: i32) -> (i32, i32) {
    %c0_i32 = arith.constant 0 : i32
    %c0_i32_0 = arith.constant 0 : i32
    %c0_i32_1 = arith.constant 0 : i32
    return %c0_i32, %c0_i32_0 : i32, i32
  }
  func.func @transform_2(%arg0: i32) -> (i32, i32) {
    %c0_i32 = arith.constant 0 : i32
    %c0_i32_0 = arith.constant 0 : i32
    %c0_i32_1 = arith.constant 0 : i32
    return %c0_i32, %c0_i32_0 : i32, i32
  }
  func.func @transform_3(%arg0: i32) -> (i32, i32) {
    %c0_i32 = arith.constant 0 : i32
    %c0_i32_0 = arith.constant 0 : i32
    %c0_i32_1 = arith.constant 0 : i32
    return %c0_i32, %c0_i32_0 : i32, i32
  }
  func.func @transform_4(%arg0: i32) -> (i32, i32) {
    %c0_i32 = arith.constant 0 : i32
    %c0_i32_0 = arith.constant 0 : i32
    %c0_i32_1 = arith.constant 0 : i32
    return %c0_i32, %c0_i32_0 : i32, i32
  }
  func.func @transform_5(%arg0: i32) -> (i32, i32) {
    %c0_i32 = arith.constant 0 : i32
    %c0_i32_0 = arith.constant 0 : i32
    %c0_i32_1 = arith.constant 0 : i32
    return %c0_i32, %c0_i32_0 : i32, i32
  }
  func.func @transform_6(%arg0: i32) -> (i32, i32) {
    %c0_i32 = arith.constant 0 : i32
    %c0_i32_0 = arith.constant 0 : i32
    %c0_i32_1 = arith.constant 0 : i32
    return %c0_i32, %c0_i32_0 : i32, i32
  }
  func.func @transform_7(%arg0: i32) -> (i32, i32) {
    %c0_i32 = arith.constant 0 : i32
    %c0_i32_0 = arith.constant 0 : i32
    %c0_i32_1 = arith.constant 0 : i32
    return %c0_i32, %c0_i32_0 : i32, i32
  }
  func.func @transform_8(%arg0: i32) -> (i32, i32) {
    %c0_i32 = arith.constant 0 : i32
    %c0_i32_0 = arith.constant 0 : i32
    %c0_i32_1 = arith.constant 0 : i32
    return %c0_i32, %c0_i32_0 : i32, i32
  }
  func.func @transform_9(%arg0: i32) -> (i32, i32) {
    %c0_i32 = arith.constant 0 : i32
    %c0_i32_0 = arith.constant 0 : i32
    return %c0_i32, %arg0 : i32, i32
  }
}

</mosaic_0001>

<bundles_post_ra>
// kernel: tpu_custom_call.1
= control target key start
LH: loop header
LB: loop body
LE: loop exit
PB: predicated region body
PF: predicated region fallthrough
CT: control target
= control target key end

     0   :  { %s1633_s0 = inlined_call_operand.vmem [shape: bf16[32,128], index: 0, kind: input, shape index: {}]   ;;  %s1634_s1 = inlined_call_operand.vmem [shape: bf16[128,32], index: 1, kind: input, shape index: {}]   ;;  %s1635_s2 = inlined_call_operand.vmem [shape: f32[128,1], index: 2, kind: input, shape index: {}]   ;;  %s1636_s3 = inlined_call_operand.vmem [shape: bf16[128,128], index: 3, kind: input, shape index: {}]   ;;  %s1637_s4 = inlined_call_operand.vmem [shape: f32[128,1], index: 4, kind: input, shape index: {}]   ;;  %s1638_s5 = inlined_call_operand.vmem [shape: bf16[128,128], index: 5, kind: input, shape index: {}]   ;;  %s1639_s6 = inlined_call_operand.vmem [shape: f32[128,1], index: 6, kind: input, shape index: {}]   ;;  %s1640_s7 = inlined_call_operand.vmem [shape: f32[128,1], index: 7, kind: input, shape index: {}]   ;;  %s1641_s8 = inlined_call_operand.<no memory space> [shape: f32[1,1], index: 8, kind: input, shape index: {}]   ;;  %s1642_s9 = inlined_call_operand.hbm [shape: f32[1,128], index: 9, kind: output, shape index: {}]  }
   0x1   :  { %v14_v0 = vstv %s1641_s8 }
   0x2   :  { %15 = vst [vmem:[#allocation2] sm:$0x1] %v14_v0 }
   0x3   :  { %v58_v1 = vld [vmem:[%s1635_s2 + $0x10] sm:$0xff]  ;;  %v56_v2 = vld [vmem:[%s1635_s2] sm:$0xff]  ;;  %v1288_v3 = vmov 0   ;;  %v59_v5 = vld [vmem:[%s1635_s2 + $0x18] sm:$0xff]  ;;  %vm204_vm0 = vcmask 261120  }
   0x4   :  { %1233 = vset.pattern.permute.xlu1 %v1288_v3  ;;  %1232 = vset.pattern.permute.xlu0 %v1288_v3  ;;  %v1234_v4 = vld [vmem:[%s1633_s0] sm:$0xff]   ;;  %v57_v6 = vld [vmem:[%s1635_s2 + $0x8] sm:$0xff]  ;;  %v1238_v12 = vld [vmem:[%s1634_s1 + $0x10] sm:$0xff]  }
   0x5   :  { %84 = vperm.xlu1 %1233, %v58_v1   ;;  %74 = vperm.xlu0 %1232, %v56_v2   ;;  %v1235_v7 = vld [vmem:[%s1633_s0 + $0x8] sm:$0xff]   ;;  %v1236_v8 = vld [vmem:[%s1634_s1] sm:$0xff]   ;;  %v63_v13 = vld [vmem:[%s1635_s2 + $0x38] sm:$0xff] }
   0x6   :  { %1146 = vmatprep.subr.bf16.mxu0 %v1234_v4  ;;  %v61_v9 = vld [vmem:[%s1635_s2 + $0x28] sm:$0xff]  ;;  %v60_v10 = vld [vmem:[%s1635_s2 + $0x20] sm:$0xff]  ;;  %1150 = vmatprep.mubr.msk.bf16.mxu0 %vm204_vm0, %v1236_v8  ;;  %v62_v14 = vld [vmem:[%s1635_s2 + $0x30] sm:$0xff] }
   0x7   :  { %1147 = vmatpush3.bf16.msra.mxu0 %v1234_v4  ;;  %v1237_v11 = vld [vmem:[%s1634_s1 + $0x8] sm:$0xff]   ;;  %v64_v16 = vld [vmem:[%s1635_s2 + $0x40] sm:$0xff]  ;;  %v1239_v17 = vld [vmem:[%s1634_s1 + $0x18] sm:$0xff]  }
   0x8   :  { %1148 = vmatprep.subr.bf16.mxu0 %v1235_v7  ;;  %v65_v15 = vld [vmem:[%s1635_s2 + $0x48] sm:$0xff]  ;;  %v1240_v18 = vld [vmem:[%s1634_s1 + $0x20] sm:$0xff]   ;;  %v67_v19 = vld [vmem:[%s1635_s2 + $0x58] sm:$0xff] }
   0x9   :  { %89 = vperm.xlu1 %1233, %v59_v5   ;;  %79 = vperm.xlu0 %1232, %v57_v6   ;;  %v66_v20 = vld [vmem:[%s1635_s2 + $0x50] sm:$0xff]  ;;  %v69_v21 = vld [vmem:[%s1635_s2 + $0x68] sm:$0xff]  ;;  %v68_v22 = vld [vmem:[%s1635_s2 + $0x60] sm:$0xff] }
   0xa   :  { %v1241_v23 = vld [vmem:[%s1634_s1 + $0x28] sm:$0xff]   ;;  %v1242_v24 = vld [vmem:[%s1634_s1 + $0x30] sm:$0xff]   ;;  %v71_v25 = vld [vmem:[%s1635_s2 + $0x78] sm:$0xff] }
   0xb   :  { %1149 = vmatpush3.bf16.msra.mxu0 %v1235_v7  ;;  %v70_v26 = vld [vmem:[%s1635_s2 + $0x70] sm:$0xff]  ;;  %v367_v27 = vld [vmem:[%s1637_s4 + $0x8] sm:$0xff]  ;;  %v366_v28 = vld [vmem:[%s1637_s4] sm:$0xff] }
   0xc   :  { %v1243_v29 = vld [vmem:[%s1634_s1 + $0x38] sm:$0xff]   ;;  %v368_v31 = vld [vmem:[%s1637_s4 + $0x10] sm:$0xff]  ;;  %v371_v32 = vld [vmem:[%s1637_s4 + $0x28] sm:$0xff] }
   0xd   :  { %99 = vperm.xlu1 %1233, %v61_v9   ;;  %94 = vperm.xlu0 %1232, %v60_v10   ;;  %v369_v30 = vld [vmem:[%s1637_s4 + $0x18] sm:$0xff]  ;;  %v370_v33 = vld [vmem:[%s1637_s4 + $0x20] sm:$0xff] }
   0xe   :  { %1151 = vmatmul.mubr.msk.bf16.vlgmr.msra.gmra.mrb[0].mxu0 %vm204_vm0, %v1237_v11 }
   0xf   :  { %1154 = vmatprep.mubr.msk.bf16.mxu0 %vm204_vm0, %v1238_v12 }
  0x11   :  { %109 = vperm.xlu1 %1233, %v63_v13   ;;  %104 = vperm.xlu0 %1232, %v62_v14  }
  0x15   :  { %119 = vperm.xlu1 %1233, %v65_v15   ;;  %114 = vperm.xlu0 %1232, %v64_v16  }
  0x16   :  { %1155 = vmatmul.mubr.msk.bf16.gmra.mrb[4].mxu0 %vm204_vm0, %v1239_v17 }
  0x17   :  { %1158 = vmatprep.mubr.msk.bf16.mxu0 %vm204_vm0, %v1240_v18 }
  0x19   :  { %129 = vperm.xlu1 %1233, %v67_v19   ;;  %124 = vperm.xlu0 %1232, %v66_v20  }
  0x1d   :  { %139 = vperm.xlu1 %1233, %v69_v21   ;;  %134 = vperm.xlu0 %1232, %v68_v22  }
  0x1e   :  { %1159 = vmatmul.mubr.msk.bf16.gmra.mrb[8].mxu0 %vm204_vm0, %v1241_v23 }
  0x1f   :  { %1162 = vmatprep.mubr.msk.bf16.mxu0 %vm204_vm0, %v1242_v24 }
  0x21   :  { %149 = vperm.xlu1 %1233, %v71_v25   ;;  %144 = vperm.xlu0 %1232, %v70_v26  }
  0x25   :  { %389 = vperm.xlu1 %1233, %v367_v27   ;;  %384 = vperm.xlu0 %1232, %v366_v28  }
  0x26   :  { %1163 = vmatmul.mubr.msk.bf16.gmra.mrb[12].mxu0 %vm204_vm0, %v1243_v29 }
  0x29   :  { %399 = vperm.xlu1 %1233, %v369_v30   ;;  %394 = vperm.xlu0 %1232, %v368_v31  }
  0x2d   :  { %409 = vperm.xlu1 %1233, %v371_v32   ;;  %404 = vperm.xlu0 %1232, %v370_v33  }
  0x2e   :  { %16 = vsyncpa [#allocation4], 0  ;;  %v373_v34 = vld [vmem:[%s1637_s4 + $0x38] sm:$0xff]  ;;  %v372_v35 = vld [vmem:[%s1637_s4 + $0x30] sm:$0xff] }
  0x2f   :  { %v375_v36 = vld [vmem:[%s1637_s4 + $0x48] sm:$0xff]  ;;  %v374_v37 = vld [vmem:[%s1637_s4 + $0x40] sm:$0xff]  ;;  %v377_v38 = vld [vmem:[%s1637_s4 + $0x58] sm:$0xff] }
  0x30   :  { %v376_v39 = vld [vmem:[%s1637_s4 + $0x50] sm:$0xff]  ;;  %v379_v40 = vld [vmem:[%s1637_s4 + $0x68] sm:$0xff]  ;;  %v378_v41 = vld [vmem:[%s1637_s4 + $0x60] sm:$0xff] }
  0x31   :  { %419 = vperm.xlu1 %1233, %v373_v34   ;;  %414 = vperm.xlu0 %1232, %v372_v35   ;;  %v381_v42 = vld [vmem:[%s1637_s4 + $0x78] sm:$0xff]  ;;  %v380_v43 = vld [vmem:[%s1637_s4 + $0x70] sm:$0xff]  ;;  %v648_v44 = vld [vmem:[%s1639_s6 + $0x8] sm:$0xff] }
  0x32   :  { %v647_v45 = vld [vmem:[%s1639_s6] sm:$0xff]  ;;  %v650_v46 = vld [vmem:[%s1639_s6 + $0x18] sm:$0xff]  ;;  %v649_v47 = vld [vmem:[%s1639_s6 + $0x10] sm:$0xff] }
  0x33   :  { %v905_v48 = vld [vmem:[%s1640_s7 + $0x8] sm:$0xff]  ;;  %v904_v49 = vld [vmem:[%s1640_s7] sm:$0xff]  ;;  %v906_v50 = vld [vmem:[%s1640_s7 + $0x10] sm:$0xff] }
  0x34   :  { %v651_v51 = vld [vmem:[%s1639_s6 + $0x20] sm:$0xff]  ;;  %v907_v52 = vld [vmem:[%s1640_s7 + $0x18] sm:$0xff]  ;;  %v652_v53 = vld [vmem:[%s1639_s6 + $0x28] sm:$0xff] }
  0x35   :  { %429 = vperm.xlu1 %1233, %v375_v36   ;;  %424 = vperm.xlu0 %1232, %v374_v37   ;;  %v908_v54 = vld [vmem:[%s1640_s7 + $0x20] sm:$0xff]  ;;  %v653_v55 = vld [vmem:[%s1639_s6 + $0x30] sm:$0xff]  ;;  %v909_v56 = vld [vmem:[%s1640_s7 + $0x28] sm:$0xff] }
  0x36   :  { %v654_v57 = vld [vmem:[%s1639_s6 + $0x38] sm:$0xff]  ;;  %v910_v58 = vld [vmem:[%s1640_s7 + $0x30] sm:$0xff]  ;;  %v655_v59 = vld [vmem:[%s1639_s6 + $0x40] sm:$0xff] }
  0x37   :  { %v911_v60 = vld [vmem:[%s1640_s7 + $0x38] sm:$0xff]  ;;  %v656_v61 = vld [vmem:[%s1639_s6 + $0x48] sm:$0xff]  ;;  %v912_v62 = vld [vmem:[%s1640_s7 + $0x40] sm:$0xff] }
  0x38   :  { %v657_v63 = vld [vmem:[%s1639_s6 + $0x50] sm:$0xff]  ;;  %v913_v0 = vld [vmem:[%s1640_s7 + $0x48] sm:$0xff]  ;;  %v658_v1 = vld [vmem:[%s1639_s6 + $0x58] sm:$0xff] }
  0x39   :  { %439 = vperm.xlu1 %1233, %v377_v38   ;;  %434 = vperm.xlu0 %1232, %v376_v39   ;;  %v914_v2 = vld [vmem:[%s1640_s7 + $0x50] sm:$0xff]  ;;  %v659_v3 = vld [vmem:[%s1639_s6 + $0x60] sm:$0xff]  ;;  %v915_v4 = vld [vmem:[%s1640_s7 + $0x58] sm:$0xff] }
  0x3a   :  { %v660_v5 = vld [vmem:[%s1639_s6 + $0x68] sm:$0xff]  ;;  %v916_v6 = vld [vmem:[%s1640_s7 + $0x60] sm:$0xff]  ;;  %v661_v7 = vld [vmem:[%s1639_s6 + $0x70] sm:$0xff] }
  0x3b   :  { %v917_v8 = vld [vmem:[%s1640_s7 + $0x68] sm:$0xff]  ;;  %v662_v9 = vld [vmem:[%s1639_s6 + $0x78] sm:$0xff]  ;;  %v918_v11 = vld [vmem:[%s1640_s7 + $0x70] sm:$0xff] }
  0x3c   :  { %v919_v10 = vld [vmem:[%s1640_s7 + $0x78] sm:$0xff]  ;;  %v1037_v12 = vld [vmem:[#allocation2] sm:$0x1] }
  0x3d   :  { %449 = vperm.xlu1 %1233, %v379_v40   ;;  %444 = vperm.xlu0 %1232, %v378_v41   ;;  %v1244_v13 = vld [vmem:[%s1636_s3] sm:$0xff]  }
  0x3e   :  { %1182 = vmatprep.mubr.bf16.mxu1 %v1244_v13 }
  0x41   :  { %459 = vperm.xlu1 %1233, %v381_v42   ;;  %454 = vperm.xlu0 %1232, %v380_v43  }
  0x45   :  { %670 = vperm.xlu1 %1233, %v648_v44   ;;  %665 = vperm.xlu0 %1232, %v647_v45  }
  0x49   :  { %680 = vperm.xlu1 %1233, %v650_v46   ;;  %675 = vperm.xlu0 %1232, %v649_v47  }
  0x4d   :  { %927 = vperm.xlu1 %1233, %v905_v48   ;;  %922 = vperm.xlu0 %1232, %v904_v49  }
  0x51   :  { %932 = vperm.xlu1 %1233, %v906_v50   ;;  %685 = vperm.xlu0 %1232, %v651_v51  }
  0x55   :  { %937 = vperm.xlu1 %1233, %v907_v52   ;;  %690 = vperm.xlu0 %1232, %v652_v53  }
  0x59   :  { %942 = vperm.xlu1 %1233, %v908_v54   ;;  %695 = vperm.xlu0 %1232, %v653_v55  }
  0x5d   :  { %947 = vperm.xlu1 %1233, %v909_v56   ;;  %700 = vperm.xlu0 %1232, %v654_v57  }
  0x61   :  { %952 = vperm.xlu1 %1233, %v910_v58   ;;  %705 = vperm.xlu0 %1232, %v655_v59  }
  0x65   :  { %957 = vperm.xlu1 %1233, %v911_v60   ;;  %710 = vperm.xlu0 %1232, %v656_v61  }
  0x69   :  { %962 = vperm.xlu1 %1233, %v912_v62   ;;  %715 = vperm.xlu0 %1232, %v657_v63  }
  0x6d   :  { %967 = vperm.xlu1 %1233, %v913_v0   ;;  %720 = vperm.xlu0 %1232, %v658_v1  }
  0x71   :  { %972 = vperm.xlu1 %1233, %v914_v2   ;;  %725 = vperm.xlu0 %1232, %v659_v3  }
  0x75   :  { %977 = vperm.xlu1 %1233, %v915_v4   ;;  %730 = vperm.xlu0 %1232, %v660_v5  }
  0x79   :  { %982 = vperm.xlu1 %1233, %v916_v6   ;;  %735 = vperm.xlu0 %1232, %v661_v7  }
  0x7d   :  { %987 = vperm.xlu1 %1233, %v917_v8   ;;  %740 = vperm.xlu0 %1232, %v662_v9  }
  0x81   :  { %997 = vperm.xlu1 %1233, %v919_v10   ;;  %992 = vperm.xlu0 %1232, %v918_v11  }
  0x84   :  { %v75_v14 = vpop.permute.xlu0 %74  ;;  %v85_v15 = vpop.permute.xlu1 %84 }
  0x85   :  { %1040 = vperm.xlu0 %1232, %v1037_v12  }
  0x88   :  { %v80_v16 = vpop.permute.xlu0 %79  ;;  %v90_v17 = vpop.permute.xlu1 %89 }
  0x8c   :  { %v95_v18 = vpop.permute.xlu0 %94  ;;  %v100_v19 = vpop.permute.xlu1 %99 }
  0x90   :  { %v105_v20 = vpop.permute.xlu0 %104  ;;  %v110_v24 = vpop.permute.xlu1 %109 }
  0x94   :  { %v115_v32 = vpop.permute.xlu0 %114  ;;  %v120_v36 = vpop.permute.xlu1 %119 }
  0x98   :  { %v125_v44 = vpop.permute.xlu0 %124  ;;  %v130_v49 = vpop.permute.xlu1 %129 }
  0x9c   :  { %v135_v57 = vpop.permute.xlu0 %134  ;;  %v140_v61 = vpop.permute.xlu1 %139 }
  0xa0   :  { %v145_v5 = vpop.permute.xlu0 %144  ;;  %v150_v10 = vpop.permute.xlu1 %149 }
  0xe1   :  { %v1152_v21 = vpop.f32.mrb[0].mxu0 }
  0xe2   :  { %v272_v22 = vadd.f32 %v1152_v21, %v85_v15  ;;  %v263_v23 = vpop.f32.mrb[1].mxu0 }
  0xe3   :  { %v1153_v25 = vpop.f32.mrb[2].mxu0  ;;  %v264_v26 = vadd.f32 %v263_v23, %v75_v14  ;;  %v1246_v23 = vld [vmem:[%s1636_s3 + $0x10] sm:$0xff]  }
  0xe4   :  { %v275_v27 = vadd.f32 %v1153_v25, %v90_v17  ;;  %v266_v28 = vpop.f32.mrb[3].mxu0  ;;  %v328_v29 = vmax.f32 %v272_v22, 0.0  ;;  %v1245_v22 = vld [vmem:[%s1636_s3 + $0x8] sm:$0xff]   ;;  %v1248_v25 = vld [vmem:[%s1636_s3 + $0x20] sm:$0xff]  }
  0xe5   :  { %v267_v31 = vadd.f32 %v266_v28, %v80_v16  ;;  %v326_v33 = vmax.f32 %v264_v26, 0.0  ;;  %v1249_v26 = vld [vmem:[%s1636_s3 + $0x28] sm:$0xff]   ;;  %v1251_v28 = vld [vmem:[%s1636_s3 + $0x38] sm:$0xff]  }
  0xe6   :  { %v329_v30 = vmax.f32 %v275_v27, 0.0  ;;  %v1250_v27 = vld [vmem:[%s1636_s3 + $0x30] sm:$0xff]  }
  0xe7   :  { %v327_v35 = vmax.f32 %v267_v31, 0.0  ;;  %v390_v31 = vpop.permute.xlu1 %389 }
  0xe8   :  { %v359_v34 = vpack.c.bf16 %v329_v30, %v328_v29  ;;  %v1252_v29 = vld [vmem:[%s1638_s5] sm:$0xff]   ;;  %v385_v30 = vpop.permute.xlu0 %384 }
  0xe9   :  { %v1156_v37 = vpop.f32.mrb[4].mxu0  ;;  %v358_v40 = vpack.c.bf16 %v327_v35, %v326_v33  ;;  %1214 = vmatprep.mubr.bf16.mxu0 %v1252_v29 }
  0xea   :  { %v288_v38 = vadd.f32 %v1156_v37, %v105_v20  ;;  %v279_v39 = vpop.f32.mrb[5].mxu0 }
  0xeb   :  { %v1157_v41 = vpop.f32.mrb[6].mxu0  ;;  %v280_v42 = vadd.f32 %v279_v39, %v95_v18  ;;  %1166 = vmatprep.subr.bf16.mxu1 %v358_v40  ;;  %v400_v33 = vpop.permute.xlu1 %399 }
  0xec   :  { %v291_v43 = vadd.f32 %v1157_v41, %v110_v24  ;;  %v282_v45 = vpop.f32.mrb[7].mxu0  ;;  %1167 = vmatpush3.bf16.msra.mxu1 %v358_v40  ;;  %v332_v46 = vmax.f32 %v288_v38, 0.0  ;;  %v1247_v24 = vld [vmem:[%s1636_s3 + $0x18] sm:$0xff]  }
  0xed   :  { %v283_v48 = vadd.f32 %v282_v45, %v100_v19  ;;  %1168 = vmatprep.subr.bf16.mxu1 %v359_v34  ;;  %v330_v50 = vmax.f32 %v280_v42, 0.0 }
  0xee   :  { %v333_v47 = vmax.f32 %v291_v43, 0.0 }
  0xef   :  { %v331_v52 = vmax.f32 %v283_v48, 0.0  ;;  %v410_v35 = vpop.permute.xlu1 %409 }
  0xf0   :  { %v361_v51 = vpack.c.bf16 %v333_v47, %v332_v46  ;;  %1169 = vmatpush3.bf16.msra.mxu1 %v359_v34 }
  0xf1   :  { %v1160_v53 = vpop.f32.mrb[8].mxu0  ;;  %v360_v54 = vpack.c.bf16 %v331_v52, %v330_v50 }
  0xf2   :  { %v304_v55 = vadd.f32 %v1160_v53, %v125_v44  ;;  %v295_v56 = vpop.f32.mrb[9].mxu0 }
  0xf3   :  { %v1161_v58 = vpop.f32.mrb[10].mxu0  ;;  %v296_v59 = vadd.f32 %v295_v56, %v115_v32  ;;  %1170 = vmatprep.subr.bf16.mxu1 %v360_v54  ;;  %v395_v32 = vpop.permute.xlu0 %394 }
  0xf4   :  { %v307_v60 = vadd.f32 %v1161_v58, %v130_v49  ;;  %v298_v62 = vpop.f32.mrb[11].mxu0  ;;  %1171 = vmatpush3.bf16.msra.mxu1 %v360_v54  ;;  %v336_v63 = vmax.f32 %v304_v55, 0.0  ;;  %v420_v40 = vpop.permute.xlu1 %419 }
  0xf5   :  { %v299_v1 = vadd.f32 %v298_v62, %v120_v36  ;;  %1172 = vmatprep.subr.bf16.mxu1 %v361_v51  ;;  %v334_v2 = vmax.f32 %v296_v59, 0.0 }
  0xf6   :  { %v337_v0 = vmax.f32 %v307_v60, 0.0 }
  0xf7   :  { %v335_v4 = vmax.f32 %v299_v1, 0.0  ;;  %v405_v34 = vpop.permute.xlu0 %404 }
  0xf8   :  { %v363_v3 = vpack.c.bf16 %v337_v0, %v336_v63  ;;  %1173 = vmatpush3.bf16.msra.mxu1 %v361_v51  ;;  %v430_v52 = vpop.permute.xlu1 %429 }
  0xf9   :  { %v1164_v6 = vpop.f32.mrb[12].mxu0  ;;  %v362_v7 = vpack.c.bf16 %v335_v4, %v334_v2 }
  0xfa   :  { %v320_v8 = vadd.f32 %v1164_v6, %v145_v5  ;;  %v311_v9 = vpop.f32.mrb[13].mxu0 }
  0xfb   :  { %v1165_v11 = vpop.f32.mrb[14].mxu0  ;;  %v312_v12 = vadd.f32 %v311_v9, %v135_v57  ;;  %1174 = vmatprep.subr.bf16.mxu1 %v362_v7  ;;  %v415_v36 = vpop.permute.xlu0 %414 }
  0xfc   :  { %v323_v13 = vadd.f32 %v1165_v11, %v150_v10  ;;  %v314_v14 = vpop.f32.mrb[15].mxu0  ;;  %1175 = vmatpush3.bf16.msra.mxu1 %v362_v7  ;;  %v340_v15 = vmax.f32 %v320_v8, 0.0  ;;  %v440_v1 = vpop.permute.xlu1 %439 }
  0xfd   :  { %v315_v17 = vadd.f32 %v314_v14, %v140_v61  ;;  %1176 = vmatprep.subr.bf16.mxu1 %v363_v3  ;;  %v338_v18 = vmax.f32 %v312_v12, 0.0 }
  0xfe   :  { %v341_v16 = vmax.f32 %v323_v13, 0.0 }
  0xff   :  { %v339_v20 = vmax.f32 %v315_v17, 0.0  ;;  %v425_v48 = vpop.permute.xlu0 %424 }
 0x100   :  { %v365_v19 = vpack.c.bf16 %v341_v16, %v340_v15  ;;  %1177 = vmatpush3.bf16.msra.mxu1 %v363_v3  ;;  %v450_v14 = vpop.permute.xlu1 %449 }
 0x101   :  { %v364_v21 = vpack.c.bf16 %v339_v20, %v338_v18 }
 0x103   :  { %1178 = vmatprep.subr.bf16.mxu1 %v364_v21  ;;  %v435_v61 = vpop.permute.xlu0 %434 }
 0x104   :  { %1179 = vmatpush3.bf16.msra.mxu1 %v364_v21 }
 0x105   :  { %1180 = vmatprep.subr.bf16.mxu1 %v365_v19 }
 0x107   :  { %v445_v9 = vpop.permute.xlu0 %444 }
 0x108   :  { %1181 = vmatpush3.bf16.msra.mxu1 %v365_v19 }
 0x10b   :  { %1183 = vmatmul.mubr.bf16.vlgmr.msra.gmra.mrb[0].mxu1 %v1245_v22  ;;  %v455_v21 = vpop.permute.xlu0 %454 }
 0x10c   :  { %1186 = vmatprep.mubr.bf16.mxu1 %v1246_v23 }
 0x113   :  { %1187 = vmatmul.mubr.bf16.gmra.mrb[4].mxu1 %v1247_v24 }
 0x114   :  { %1190 = vmatprep.mubr.bf16.mxu1 %v1248_v25 }
 0x11b   :  { %1191 = vmatmul.mubr.bf16.gmra.mrb[8].mxu1 %v1249_v26  ;;  %v460_v26 = vpop.permute.xlu1 %459 }
 0x11c   :  { %1194 = vmatprep.mubr.bf16.mxu1 %v1250_v27 }
 0x123   :  { %1195 = vmatmul.mubr.bf16.gmra.mrb[12].mxu1 %v1251_v28 }
 0x1de   :  { %v1184_v37 = vpop.f32.mrb[0].mxu1 }
 0x1df   :  { %v553_v38 = vadd.f32 %v1184_v37, %v395_v32  ;;  %v544_v39 = vpop.f32.mrb[1].mxu1 }
 0x1e0   :  { %v545_v41 = vadd.f32 %v544_v39, %v385_v30  ;;  %v1185_v42 = vpop.f32.mrb[2].mxu1  ;;  %v1254_v39 = vld [vmem:[%s1638_s5 + $0x10] sm:$0xff]  }
 0x1e1   :  { %v556_v43 = vadd.f32 %v1185_v42, %v400_v33  ;;  %v547_v44 = vpop.f32.mrb[3].mxu1  ;;  %v609_v46 = vmax.f32 %v553_v38, 0.0  ;;  %v1253_v38 = vld [vmem:[%s1638_s5 + $0x8] sm:$0xff]  }
 0x1e2   :  { %v548_v45 = vadd.f32 %v547_v44, %v390_v31  ;;  %v607_v49 = vmax.f32 %v545_v41, 0.0  ;;  %v1256_v41 = vld [vmem:[%s1638_s5 + $0x20] sm:$0xff]   ;;  %v1257_v42 = vld [vmem:[%s1638_s5 + $0x28] sm:$0xff]   ;;  %v1259_v44 = vld [vmem:[%s1638_s5 + $0x38] sm:$0xff]  }
 0x1e3   :  { %v610_v47 = vmax.f32 %v556_v43, 0.0  ;;  %v1258_v43 = vld [vmem:[%s1638_s5 + $0x30] sm:$0xff]  }
 0x1e4   :  { %v608_v50 = vmax.f32 %v548_v45, 0.0  ;;  %v666_v45 = vpop.permute.xlu0 %665 }
 0x1e5   :  { %v640_v51 = vpack.c.bf16 %v610_v47, %v609_v46  ;;  %v671_v46 = vpop.permute.xlu1 %670 }
 0x1e6   :  { %v639_v53 = vpack.c.bf16 %v608_v50, %v607_v49  ;;  %v1188_v54 = vpop.f32.mrb[4].mxu1 }
 0x1e7   :  { %v569_v55 = vadd.f32 %v1188_v54, %v415_v36  ;;  %v560_v56 = vpop.f32.mrb[5].mxu1 }
 0x1e8   :  { %v561_v57 = vadd.f32 %v560_v56, %v405_v34  ;;  %v1189_v58 = vpop.f32.mrb[6].mxu1  ;;  %1198 = vmatprep.subr.bf16.mxu0 %v639_v53  ;;  %v676_v47 = vpop.permute.xlu0 %675 }
 0x1e9   :  { %v572_v59 = vadd.f32 %v1189_v58, %v420_v40  ;;  %v563_v60 = vpop.f32.mrb[7].mxu1  ;;  %1199 = vmatpush3.bf16.msra.mxu0 %v639_v53  ;;  %v613_v63 = vmax.f32 %v569_v55, 0.0  ;;  %v1255_v40 = vld [vmem:[%s1638_s5 + $0x18] sm:$0xff]   ;;  %s1289_s5 = smov [#allocation3]  }
 0x1ea   :  { %v564_v62 = vadd.f32 %v563_v60, %v410_v35  ;;  %1200 = vmatprep.subr.bf16.mxu0 %v640_v51  ;;  %v611_v2 = vmax.f32 %v561_v57, 0.0  ;;  %s1061_s7 = sshll.u32 %s1289_s5, 4  ;;  %s1062_s7 = int_to_ptr.vmem [resolvable:$true] %s1061_s7 }
 0x1eb   :  { %v614_v0 = vmax.f32 %v572_v59, 0.0  ;;  %s1264_s12 = scalar_lea.vmem %s1062_s7, 16  ;;  %s1268_s13 = scalar_lea.vmem %s1062_s7, 32 }
 0x1ec   :  { %v612_v3 = vmax.f32 %v564_v62, 0.0  ;;  %v923_v49 = vpop.permute.xlu0 %922  ;;  %p1265_p0 = scmp.ne.s32.totalorder %s1062_s7, %s1264_s12  ;;  %p1269_p1 = scmp.lt.s32.totalorder %s1062_s7, %s1062_s7 }
 0x1ed   :  { %v642_v4 = vpack.c.bf16 %v614_v0, %v613_v63  ;;  %1201 = vmatpush3.bf16.msra.mxu0 %v640_v51  ;;  %p1270_p2 = scmp.lt.s32.totalorder %s1268_s13, %s1264_s12 }
 0x1ee   :  { %v641_v5 = vpack.c.bf16 %v612_v3, %v611_v2  ;;  %v1192_v6 = vpop.f32.mrb[8].mxu1 }
 0x1ef   :  { %v585_v7 = vadd.f32 %v1192_v6, %v435_v61  ;;  %v576_v8 = vpop.f32.mrb[9].mxu1  ;;  %p1271_p3 = por %p1270_p2, %p1269_p1 }
 0x1f0   :  { %v577_v10 = vadd.f32 %v576_v8, %v425_v48  ;;  %v1193_v11 = vpop.f32.mrb[10].mxu1  ;;  %1202 = vmatprep.subr.bf16.mxu0 %v641_v5  ;;  %v681_v48 = vpop.permute.xlu1 %680 }
 0x1f1   :  { %v588_v12 = vadd.f32 %v1193_v11, %v440_v1  ;;  %v579_v13 = vpop.f32.mrb[11].mxu1  ;;  %1203 = vmatpush3.bf16.msra.mxu0 %v641_v5  ;;  %v617_v16 = vmax.f32 %v585_v7, 0.0  ;;  %v686_v51 = vpop.permute.xlu0 %685  ;;  %p1272_p4 = pnand %p1271_p3, %p1265_p0 }
 0x1f2   :  { %v580_v15 = vadd.f32 %v579_v13, %v430_v52  ;;  %1204 = vmatprep.subr.bf16.mxu0 %v642_v4  ;;  %v615_v18 = vmax.f32 %v577_v10, 0.0 }
 0x1f3   :  { %v618_v17 = vmax.f32 %v588_v12, 0.0 }
 0x1f4   :  { %v616_v19 = vmax.f32 %v580_v15, 0.0  ;;  %v928_v50 = vpop.permute.xlu1 %927 }
 0x1f5   :  { %v644_v20 = vpack.c.bf16 %v618_v17, %v617_v16  ;;  %1205 = vmatpush3.bf16.msra.mxu0 %v642_v4  ;;  %v691_v53 = vpop.permute.xlu0 %690 }
 0x1f6   :  { %v643_v22 = vpack.c.bf16 %v616_v19, %v615_v18  ;;  %v1196_v23 = vpop.f32.mrb[12].mxu1 }
 0x1f7   :  { %v601_v24 = vadd.f32 %v1196_v23, %v455_v21  ;;  %v592_v25 = vpop.f32.mrb[13].mxu1 }
 0x1f8   :  { %v593_v27 = vadd.f32 %v592_v25, %v445_v9  ;;  %v1197_v28 = vpop.f32.mrb[14].mxu1  ;;  %1206 = vmatprep.subr.bf16.mxu0 %v643_v22  ;;  %v933_v52 = vpop.permute.xlu1 %932 }
 0x1f9   :  { %v604_v29 = vadd.f32 %v1197_v28, %v460_v26  ;;  %v595_v30 = vpop.f32.mrb[15].mxu1  ;;  %1207 = vmatpush3.bf16.msra.mxu0 %v643_v22  ;;  %v621_v32 = vmax.f32 %v601_v24, 0.0  ;;  %v696_v55 = vpop.permute.xlu0 %695 }
 0x1fa   :  { %v596_v31 = vadd.f32 %v595_v30, %v450_v14  ;;  %1208 = vmatprep.subr.bf16.mxu0 %v644_v20  ;;  %v619_v34 = vmax.f32 %v593_v27, 0.0 }
 0x1fb   :  { %v622_v33 = vmax.f32 %v604_v29, 0.0 }
 0x1fc   :  { %v620_v35 = vmax.f32 %v596_v31, 0.0  ;;  %v938_v54 = vpop.permute.xlu1 %937 }
 0x1fd   :  { %v646_v36 = vpack.c.bf16 %v622_v33, %v621_v32  ;;  %1209 = vmatpush3.bf16.msra.mxu0 %v644_v20  ;;  %v701_v57 = vpop.permute.xlu0 %700 }
 0x1fe   :  { %v645_v37 = vpack.c.bf16 %v620_v35, %v619_v34 }
 0x200   :  { %1210 = vmatprep.subr.bf16.mxu0 %v645_v37  ;;  %v943_v56 = vpop.permute.xlu1 %942 }
 0x201   :  { %1211 = vmatpush3.bf16.msra.mxu0 %v645_v37  ;;  %v706_v59 = vpop.permute.xlu0 %705 }
 0x202   :  { %1212 = vmatprep.subr.bf16.mxu0 %v646_v36 }
 0x204   :  { %v948_v58 = vpop.permute.xlu1 %947 }
 0x205   :  { %1213 = vmatpush3.bf16.msra.mxu0 %v646_v36  ;;  %v711_v61 = vpop.permute.xlu0 %710 }
 0x208   :  { %1215 = vmatmul.mubr.bf16.vlgmr.msra.gmra.mrb[16].mxu0 %v1253_v38  ;;  %v953_v60 = vpop.permute.xlu1 %952 }
 0x209   :  { %1218 = vmatprep.mubr.bf16.mxu0 %v1254_v39  ;;  %v716_v63 = vpop.permute.xlu0 %715 }
 0x20c   :  { %v958_v62 = vpop.permute.xlu1 %957 }
 0x20d   :  { %v721_v6 = vpop.permute.xlu0 %720 }
 0x210   :  { %1219 = vmatmul.mubr.bf16.gmra.mrb[20].mxu0 %v1255_v40  ;;  %v963_v0 = vpop.permute.xlu1 %962 }
 0x211   :  { %1222 = vmatprep.mubr.bf16.mxu0 %v1256_v41  ;;  %v726_v18 = vpop.permute.xlu0 %725 }
 0x214   :  { %v968_v11 = vpop.permute.xlu1 %967 }
 0x215   :  { %v731_v36 = vpop.permute.xlu0 %730 }
 0x218   :  { %1223 = vmatmul.mubr.bf16.gmra.mrb[24].mxu0 %v1257_v42  ;;  %v973_v25 = vpop.permute.xlu1 %972 }
 0x219   :  { %1226 = vmatprep.mubr.bf16.mxu0 %v1258_v43 }
 0x21c   :  { %v978_v41 = vpop.permute.xlu1 %977 }
 0x220   :  { %1227 = vmatmul.mubr.bf16.gmra.mrb[28].mxu0 %v1259_v44 }
 0x2db   :  { %v1216_v1 = vpop.f32.mrb[16].mxu0 }
 0x2dc   :  { %v825_v2 = vpop.f32.mrb[17].mxu0  ;;  %v834_v3 = vadd.f32 %v1216_v1, %v676_v47 }
 0x2dd   :  { %v826_v4 = vadd.f32 %v825_v2, %v666_v45  ;;  %v1217_v5 = vpop.f32.mrb[18].mxu0 }
 0x2de   :  { %v837_v7 = vadd.f32 %v1217_v5, %v681_v48  ;;  %v828_v8 = vpop.f32.mrb[19].mxu0  ;;  %v890_v12 = vmax.f32 %v834_v3, 0.0 }
 0x2df   :  { %v888_v9 = vmax.f32 %v826_v4, 0.0  ;;  %v829_v10 = vadd.f32 %v828_v8, %v671_v46 }
 0x2e0   :  { %v891_v14 = vmax.f32 %v837_v7, 0.0  ;;  %v1002_v20 = vmul.f32 %v933_v52, %v890_v12 }
 0x2e1   :  { %v889_v13 = vmax.f32 %v829_v10, 0.0  ;;  %v1000_v15 = vmul.f32 %v923_v49, %v888_v9 }
 0x2e2   :  { %v1003_v26 = vmul.f32 %v938_v54, %v891_v14  ;;  %v736_v54 = vpop.permute.xlu0 %735 }
 0x2e3   :  { %v1001_v16 = vmul.f32 %v928_v50, %v889_v13  ;;  %v1220_v17 = vpop.f32.mrb[20].mxu0 }
 0x2e4   :  { %v841_v19 = vpop.f32.mrb[21].mxu0  ;;  %v850_v22 = vadd.f32 %v1220_v17, %v696_v55 }
 0x2e5   :  { %v1016_v21 = vadd.f32 %v1001_v16, %v1000_v15  ;;  %v842_v23 = vadd.f32 %v841_v19, %v686_v51  ;;  %v1221_v24 = vpop.f32.mrb[22].mxu0 }
 0x2e6   :  { %v844_v27 = vpop.f32.mrb[23].mxu0  ;;  %v853_v30 = vadd.f32 %v1221_v24, %v701_v57  ;;  %v894_v32 = vmax.f32 %v850_v22, 0.0 }
 0x2e7   :  { %v1017_v28 = vadd.f32 %v1016_v21, %v1002_v20  ;;  %v892_v29 = vmax.f32 %v842_v23, 0.0  ;;  %v845_v31 = vadd.f32 %v844_v27, %v691_v53  ;;  %v1043_v27 = vlaneseq }
 0x2e8   :  { %v895_v38 = vmax.f32 %v853_v30, 0.0  ;;  %v1006_v43 = vmul.f32 %v953_v60, %v894_v32 }
 0x2e9   :  { %v1004_v33 = vmul.f32 %v943_v56, %v892_v29  ;;  %v1018_v34 = vadd.f32 %v1017_v28, %v1003_v26  ;;  %v893_v35 = vmax.f32 %v845_v31, 0.0  ;;  %v1044_v30 = vshrl.u32 %v1043_v27, 7 }
 0x2ea   :  { %v1007_v50 = vmul.f32 %v958_v62, %v895_v38  ;;  %v741_v62 = vpop.permute.xlu0 %740 }
 0x2eb   :  { %v1019_v37 = vadd.f32 %v1018_v34, %v1004_v33  ;;  %v1005_v39 = vmul.f32 %v948_v58, %v893_v35  ;;  %v1224_v40 = vpop.f32.mrb[24].mxu0  ;;  %v983_v58 = vpop.permute.xlu1 %982  ;;  %v1045_v33 = vsub.s32 0, %v1044_v30 }
 0x2ec   :  { %v857_v42 = vpop.f32.mrb[25].mxu0  ;;  %v866_v45 = vadd.f32 %v1224_v40, %v716_v63 }
 0x2ed   :  { %v1020_v44 = vadd.f32 %v1019_v37, %v1005_v39  ;;  %v858_v46 = vadd.f32 %v857_v42, %v706_v59  ;;  %v1225_v47 = vpop.f32.mrb[26].mxu0 }
 0x2ee   :  { %v869_v48 = vadd.f32 %v1225_v47, %v721_v6  ;;  %v860_v49 = vpop.f32.mrb[27].mxu0  ;;  %v898_v55 = vmax.f32 %v866_v45, 0.0  ;;  %v993_v22 = vpop.permute.xlu0 %992 }
 0x2ef   :  { %v1021_v51 = vadd.f32 %v1020_v44, %v1006_v43  ;;  %v896_v52 = vmax.f32 %v858_v46, 0.0  ;;  %v861_v53 = vadd.f32 %v860_v49, %v711_v61  ;;  %v988_v14 = vpop.permute.xlu1 %987 }
 0x2f0   :  { %v899_v2 = vmax.f32 %v869_v48, 0.0  ;;  %v1010_v63 = vmul.f32 %v973_v25, %v898_v55 }
 0x2f1   :  { %v1008_v56 = vmul.f32 %v963_v0, %v896_v52  ;;  %v1022_v57 = vadd.f32 %v1021_v51, %v1007_v50  ;;  %v897_v1 = vmax.f32 %v861_v53, 0.0 }
 0x2f2   :  { %v1011_v9 = vmul.f32 %v978_v41, %v899_v2  ;;  %v1041_v35 = vpop.permute.xlu0 %1040 }
 0x2f3   :  { %v1023_v3 = vadd.f32 %v1022_v57, %v1008_v56  ;;  %v1009_v4 = vmul.f32 %v968_v11, %v897_v1  ;;  %v1228_v60 = vpop.f32.mrb[28].mxu0  ;;  %v1046_v37 = vrot.slane %v1041_v35, %v1045_v33 }
 0x2f4   :  { %v873_v5 = vpop.f32.mrb[29].mxu0  ;;  %v882_v7 = vadd.f32 %v1228_v60, %v736_v54 }
 0x2f5   :  { %v1024_v59 = vadd.f32 %v1023_v3, %v1009_v4  ;;  %v874_v6 = vadd.f32 %v873_v5, %v726_v18  ;;  %v1229_v8 = vpop.f32.mrb[30].mxu0  ;;  %v998_v18 = vpop.permute.xlu1 %997 }
 0x2f6   :  { %v876_v10 = vpop.f32.mrb[31].mxu0  ;;  %v885_v13 = vadd.f32 %v1229_v8, %v741_v62  ;;  %v902_v15 = vmax.f32 %v882_v7, 0.0 }
 0x2f7   :  { %v1025_v61 = vadd.f32 %v1024_v59, %v1010_v63  ;;  %v900_v12 = vmax.f32 %v874_v6, 0.0  ;;  %v877_v0 = vadd.f32 %v876_v10, %v731_v36 }
 0x2f8   :  { %v903_v20 = vmax.f32 %v885_v13, 0.0  ;;  %v1014_v23 = vmul.f32 %v993_v22, %v902_v15 }
 0x2f9   :  { %v1012_v16 = vmul.f32 %v983_v58, %v900_v12  ;;  %v1026_v17 = vadd.f32 %v1025_v61, %v1011_v9  ;;  %v901_v19 = vmax.f32 %v877_v0, 0.0 }
 0x2fa   :  { %v1015_v25 = vmul.f32 %v998_v18, %v903_v20 }
 0x2fb   :  { %v1027_v11 = vadd.f32 %v1026_v17, %v1012_v16  ;;  %v1013_v21 = vmul.f32 %v988_v14, %v901_v19 }
 0x2fd   :  { %v1028_v24 = vadd.f32 %v1027_v11, %v1013_v21 }
 0x2ff   :  { %v1029_v26 = vadd.f32 %v1028_v24, %v1014_v23 }
 0x301   :  { %v1030_v28 = vadd.f32 %v1029_v26, %v1015_v25 }
 0x303   :  { %v1031_v29 = vrot.slane %v1030_v28, 4 }
 0x305   :  { %v1032_v31 = vadd.f32 %v1031_v29, %v1030_v28 }
 0x307   :  { %v1033_v32 = vrot.slane %v1032_v31, 2 }
 0x309   :  { %v1034_v34 = vadd.f32 %v1033_v32, %v1032_v31 }
 0x30b   :  { %v1035_v36 = vrot.slane %v1034_v34, 1 }
 0x30d   :  { %v1036_v38 = vadd.f32 %v1035_v36, %v1034_v34 }
 0x30f   :  { %v1047_v39 = vadd.f32 %v1046_v37, %v1036_v38 }
 0x311   :  { %v1103_v40 = vmul.f32 -1.442695, %v1047_v39 }
 0x313   :  { %1260 = vpow2.f32 %v1103_v40 }
 0x31d   :  { %v1261_v41 = vpop.eup %1260 }
 0x31e   :  { %v1051_v42 = vadd.f32 1.0, %v1261_v41 }
 0x320   :  { %1262 = vrcp.f32 %v1051_v42 }
 0x32a   :  { %v1263_v43 = vpop.eup %1262 }
 0x32b   :  { %1054 = vst [vmem:[#allocation3] sm:$0x1] %v1263_v43 }
 0x32c   :  { %1275 = shalt.err (!%p1272_p4)
}
 0x32d   :  { %s1276_s16 = scalar_lea.hbm %s1642_s9, 16 }
 0x32e   :  { %p1277_p5 = scmp.ne.s32.totalorder %s1642_s9, %s1276_s16  ;;  %p1280_p6 = scmp.lt.u32.totalorder %s1276_s16, %s1642_s9 }
 0x330   :  { %p1282_p7 = pnand %p1280_p6, %p1277_p5 }
 0x332   :  { %1285 = shalt.err (!%p1282_p7)
}
 0x333   :  { %1064 = dma.vmem_to_hbm [thread:$0]  %s1062_s7, 16, %s1642_s9, [#allocation4]  }
 0x334   :  { %1286 = dma.done.wait [#allocation4], 16  }
 0x335   :  { %1287 = vsyncadd [#allocation4], 4294967280 }
 0x336   :  { %1068 = vsyncpa [#allocation4], 1 }

</bundles_post_ra>
